<compile_context>
chip_gen: v7x
topology: tpu7x:2x2x1
jax: 0.10.0
libtpu: 0.0.40
codegen_flags: <defaults>
</compile_context>

<pallas_src>
import functools

import numpy as np
import jax
import jax.numpy as jnp
from jax.experimental import pallas as pl
from jax.experimental.pallas import tpu as pltpu


# ----------------------------------------------------------------------------
# tiling helpers
# ----------------------------------------------------------------------------
def _div_tile(n, target, step=8):
    """Largest divisor of n that is a multiple of `step` and <= target (else n)."""
    if n <= target:
        return n
    start = target - (target % step)
    if start < step:
        start = step
    for t in range(start, step - 1, -step):
        if n % t == 0:
            return t
    return n


def _fold_spatial(H, W, lane_target=1024):
    """Fold H*W into (S, L) with L a multiple of 128 when possible (lane-dense)."""
    M = H * W
    L = lane_target - (lane_target % 128)
    while L >= 128:
        if M % L == 0:
            return M // L, L
        L -= 128
    return H, W  # fall back to the natural (H, W) tiling


# ----------------------------------------------------------------------------
# Kernel 1: 1x1 conv (pointwise) as unrolled VPU FMAs, weights/bias in SMEM.
# Input spatial dims are pre-folded to a lane-dense (S, L) shape by the wrapper.
# ----------------------------------------------------------------------------
def _pointwise_conv_kernel(x_ref, w_ref, b_ref, o_ref, *, cin, cout, relu):
    # x_ref: (1, Cin, TS, L)   o_ref: (1, Cout, TS, L)
    # w_ref: (Cout, Cin) SMEM  b_ref: (Cout, 1) SMEM
    sp_shape = (x_ref.shape[2], x_ref.shape[3])
    for co in range(cout):
        acc = jnp.zeros(sp_shape, jnp.float32) + b_ref[co, 0]
        for ci in range(cin):
            acc = acc + x_ref[0, ci] * w_ref[co, ci]
        if relu:
            acc = jnp.maximum(acc, 0.0)
        o_ref[0, co] = acc.astype(o_ref.dtype)


def pointwise_conv_nchw(x, w, b, relu=True):
    # x: (B, Cin, H, W), w: (Cout, Cin), b: (Cout, 1)
    B, Cin, H, W = x.shape
    Cout = w.shape[0]
    S, L = _fold_spatial(H, W)
    TS = _div_tile(S, max(8, 32768 // max(L, 1)))
    xf = x.reshape(B, Cin, S, L)
    grid = (B, S // TS)
    flops = 2 * B * H * W * Cin * Cout
    bytes_accessed = 4 * B * H * W * (Cin + Cout)
    out = pl.pallas_call(
        functools.partial(_pointwise_conv_kernel, cin=Cin, cout=Cout, relu=relu),
        out_shape=jax.ShapeDtypeStruct((B, Cout, S, L), jnp.float32),
        grid=grid,
        in_specs=[
            pl.BlockSpec((1, Cin, TS, L), lambda bi, si: (bi, 0, si, 0)),
            pl.BlockSpec(memory_space=pltpu.MemorySpace.SMEM),
            pl.BlockSpec(memory_space=pltpu.MemorySpace.SMEM),
        ],
        out_specs=pl.BlockSpec((1, Cout, TS, L), lambda bi, si: (bi, 0, si, 0)),
        compiler_params=pltpu.CompilerParams(
            dimension_semantics=("parallel", "parallel")),
        cost_estimate=pl.CostEstimate(
            flops=flops, transcendentals=0, bytes_accessed=bytes_accessed),
    )(xf, w, b)
    return out.reshape(B, Cout, H, W)


# ----------------------------------------------------------------------------
# Kernel 2: FUSED cost processor.
# Stage 1 ("pre"): correlation cost slab built in VMEM scratch with
# roll+mask+single full-width stores; online soft-argmin stats -> [min, max].
# Stage 2 ("post"): D2 uniform samples in [min, max], streamed hat interpolation
# of the scratch slab + online soft-argmin disparity, disparity features out.
# The full (B, D, H, W) cost volume never touches HBM.
# ----------------------------------------------------------------------------
def _fused_cost_kernel(l_ref, r_ref, disp_ref, min_ref, max_ref, feat_ref,
                       cost_sc, *, D, D2, C, beta, margin):
    TH, W = l_ref.shape[2], l_ref.shape[3]
    NEG = -1.0e4
    w_idx = jax.lax.broadcasted_iota(jnp.int32, (TH, W), 1)

    # ---- stage 1: cost slab + online soft-argmin statistics -----------------
    m = jnp.full((TH, W), -jnp.inf, jnp.float32)
    s0 = jnp.zeros((TH, W), jnp.float32)
    s1 = jnp.zeros((TH, W), jnp.float32)
    s2 = jnp.zeros((TH, W), jnp.float32)

    for d in range(D):                         # static, unrolled
        corr = jnp.zeros((TH, W), jnp.float32)
        for c in range(C):
            # right feature shifted by d along W on the XLU (corr[w] = l[w]*r[w-d])
            r_sh = r_ref[0, c] if d == 0 else pltpu.roll(r_ref[0, c], d, 1)
            corr = corr + l_ref[0, c] * r_sh
        corr = corr * (1.0 / C)
        valid = w_idx >= d
        corr = jnp.where(valid, corr, 0.0)
        cost_sc[d] = corr                      # ONE full-width store per d

        # invalid disparities get a large negative logit (not 0) for the softmax
        logit = jnp.where(valid, corr * beta, NEG)
        m_new = jnp.maximum(m, logit)
        alpha = jnp.exp(m - m_new)
        p = jnp.exp(logit - m_new)
        s0 = s0 * alpha + p
        s1 = s1 * alpha + p * float(d)
        s2 = s2 * alpha + p * float(d * d)
        m = m_new

    inv = pl.reciprocal(s0, approx=True)       # tolerant: confidence range only
    mean = s1 * inv
    var = jnp.maximum(s2 * inv - mean * mean, 0.0)
    std = jnp.sqrt(var + 1e-6)
    mn = jnp.clip(mean - std - margin, 0.0, float(D - 1))
    mx = jnp.clip(mean + std + margin, 0.0, float(D - 1))
    min_ref[0, 0] = mn
    max_ref[0, 0] = mx

    # ---- stage 2: uniform samples in [mn, mx], hat interp, soft-argmin ------
    span = mx - mn
    denom = float(D2 - 1) if D2 > 1 else 1.0

    m2 = jnp.full((TH, W), -jnp.inf, jnp.float32)
    s0p = jnp.zeros((TH, W), jnp.float32)
    sdp = jnp.zeros((TH, W), jnp.float32)

    KG = 2                                     # sample group size: reuse cost slices
    for k0 in range(0, D2, KG):
        ks = list(range(k0, min(k0 + KG, D2)))
        samples = [mn + span * (float(k) / denom) for k in ks]
        diffs = [s for s in samples]           # running (sample - d), d starts at 0
        cs = [jnp.zeros((TH, W), jnp.float32) for _ in ks]
        for d in range(D):
            cost_d = cost_sc[d]                # one load shared across the group
            for i in range(len(ks)):
                wgt = jnp.maximum(0.0, 1.0 - jnp.abs(diffs[i]))
                cs[i] = cs[i] + wgt * cost_d
                diffs[i] = diffs[i] - 1.0      # incremental sample - d
        for i, k in enumerate(ks):
            feat_ref[0, k] = cs[i]
            logit = cs[i] * beta
            m_new = jnp.maximum(m2, logit)
            alpha = jnp.exp(m2 - m_new)
            p = jnp.exp(logit - m_new)
            s0p = s0p * alpha + p
            sdp = sdp * alpha + p * samples[i]
            m2 = m_new

    disp_ref[0, 0] = sdp / s0p                 # exact divide for the output disparity


def fused_cost_processor(left, right, D, D2, beta=5.0, margin=1.0):
    # left/right: (B, C, H, W) quarter-resolution features
    B, C, H, W = left.shape
    TH = _div_tile(H, 8)                       # small tiles: accumulators stay in vregs
    grid = (B, H // TH)
    feat_spec = pl.BlockSpec((1, C, TH, W), lambda b, h: (b, 0, h, 0))
    map_spec = pl.BlockSpec((1, 1, TH, W), lambda b, h: (b, 0, h, 0))
    flops = B * H * W * (D * (2 * C + 10) + D2 * (4 * D + 10))
    bytes_accessed = 4 * B * H * W * (2 * C + D2 + 3)
    return pl.pallas_call(
        functools.partial(_fused_cost_kernel, D=D, D2=D2, C=C,
                          beta=beta, margin=margin),
        out_shape=(
            jax.ShapeDtypeStruct((B, 1, H, W), jnp.float32),    # disparity
            jax.ShapeDtypeStruct((B, 1, H, W), jnp.float32),    # min disparity
            jax.ShapeDtypeStruct((B, 1, H, W), jnp.float32),    # max disparity
            jax.ShapeDtypeStruct((B, D2, H, W), jnp.float32),   # disparity features
        ),
        grid=grid,
        in_specs=[feat_spec, feat_spec],
        out_specs=(
            map_spec, map_spec, map_spec,
            pl.BlockSpec((1, D2, TH, W), lambda b, h: (b, 0, h, 0)),
        ),
        scratch_shapes=[pltpu.VMEM((D, TH, W), jnp.float32)],   # cost slab (VMEM only)
        compiler_params=pltpu.CompilerParams(
            dimension_semantics=("parallel", "parallel"),
            vmem_limit_bytes=48 * 1024 * 1024),
        cost_estimate=pl.CostEstimate(
            flops=flops, transcendentals=2 * B * H * W * (D + D2),
            bytes_accessed=bytes_accessed),
    )(left, right)


# ----------------------------------------------------------------------------
# Kernel 3: fused batched bilinear resize — both passes (A_h @ X, then @ A_w^T)
# in one kernel, gridded over the stacked batch dim; bf16 operands, f32 accum.
# ----------------------------------------------------------------------------
def _resize_kernel(ah_ref, x_ref, awt_ref, o_ref):
    tmp = jnp.dot(ah_ref[...], x_ref[0], preferred_element_type=jnp.float32)
    o_ref[0] = jnp.dot(tmp.astype(awt_ref.dtype), awt_ref[...],
                       preferred_element_type=jnp.float32)


def _bilinear_matrix(in_size, out_size):
    # PyTorch F.interpolate bilinear, align_corners=False
    A = np.zeros((out_size, in_size), dtype=np.float32)
    scale = in_size / out_size
    for i in range(out_size):
        src = (i + 0.5) * scale - 0.5
        src = min(max(src, 0.0), in_size - 1.0)
        i0 = int(np.floor(src))
        i1 = min(i0 + 1, in_size - 1)
        f = src - i0
        A[i, i0] += 1.0 - f
        A[i, i1] += f
    return A


def bilinear_resize(x, H_out, W_out):
    """x: (N, H_in, W_in) f32 -> (N, H_out, W_out) f32, bilinear align_corners=False."""
    N, H_in, W_in = x.shape
    cdt = jnp.bfloat16                                    # bilinear weights exact in bf16
    ah = jnp.asarray(_bilinear_matrix(H_in, H_out), cdt)  # (H_out, H_in)
    awt = jnp.asarray(_bilinear_matrix(W_in, W_out).T, cdt)  # (W_in, W_out)
    xc = x.astype(cdt)
    flops = 2 * N * (H_out * H_in * W_in + H_out * W_in * W_out)
    bytes_accessed = 2 * N * H_in * W_in + 4 * N * H_out * W_out
    return pl.pallas_call(
        _resize_kernel,
        out_shape=jax.ShapeDtypeStruct((N, H_out, W_out), jnp.float32),
        grid=(N,),
        in_specs=[
            pl.BlockSpec((H_out, H_in), lambda n: (0, 0)),
            pl.BlockSpec((1, H_in, W_in), lambda n: (n, 0, 0)),
            pl.BlockSpec((W_in, W_out), lambda n: (0, 0)),
        ],
        out_specs=pl.BlockSpec((1, H_out, W_out), lambda n: (n, 0, 0)),
        compiler_params=pltpu.CompilerParams(
            dimension_semantics=("parallel",),
            vmem_limit_bytes=48 * 1024 * 1024),
        cost_estimate=pl.CostEstimate(
            flops=flops, transcendentals=0, bytes_accessed=bytes_accessed),
    )(ah, xc, awt)


# ----------------------------------------------------------------------------
# Glue (plain JAX): pooling, reshapes, parameter plumbing
# ----------------------------------------------------------------------------
def avg_pool_nchw(x, k):
    # TODO(synk): fuse the avg-pool into the pointwise-conv kernel (one full-res read).
    B, C, H, W = x.shape
    return x.reshape(B, C, H // k, k, W // k, k).mean(axis=(3, 5))


def deep_pruner_forward(left_img, right_img, params, *, D=8, D2=8,
                        beta=5.0, margin=1.0):
    """left_img/right_img: NCHW float32 (B, 3, H, W). Returns eval-mode results."""
    B, _, H, W = left_img.shape
    H4, W4, H2, W2 = H // 4, W // 4, H // 2, W // 2

    # ---- backbone (Siamese, shared weights) --------------------------------
    # TODO(synk): full PSMNet-style feature extractor with SPP replaced by
    # avg-pool + 1x1-conv (VPU) feature extraction.
    def extract(img, k, w, b):
        return pointwise_conv_nchw(avg_pool_nchw(img, k), w, b, relu=True)

    ref_fms = extract(left_img, 4, params['w_bb'], params['b_bb'])    # (B,8,H4,W4)
    tgt_fms = extract(right_img, 4, params['w_bb'], params['b_bb'])
    low_ref = extract(left_img, 2, params['w_low'], params['b_low'])  # (B,8,H2,W2)

    # ---- fused pre+post cost stages (cost volume never leaves VMEM) ---------
    # TODO(synk): differentiable PatchMatch propagation / 3-D hourglass replaced
    # by dense correlation + soft-argmin statistics + hat-interpolated sampling.
    disp4, min_d, max_d, disp_feat = fused_cost_processor(
        ref_fms, tgt_fms, D, D2, beta, margin)

    # ---- refinement at 1/2 scale (one fused resize for features + disparity) -
    half_stack = jnp.concatenate([disp_feat, disp4 * (W2 / W4)], axis=1)  # (B,D2+1,H4,W4)
    half_up = bilinear_resize(half_stack.reshape(B * (D2 + 1), H4, W4), H2, W2)
    half_up = half_up.reshape(B, D2 + 1, H2, W2)
    up_feat, up_disp = half_up[:, :D2], half_up[:, D2:]

    feat_cat = jnp.concatenate([low_ref, up_feat, up_disp], axis=1)   # (B,8+D2+1,H2,W2)
    residual = pointwise_conv_nchw(feat_cat, params['w_ref'], params['b_ref'],
                                   relu=False)
    refined = up_disp + residual

    # ---- full-resolution interpolation (fused batched resizes) --------------
    q_stack = jnp.concatenate([disp4, min_d, max_d], axis=0) * (W / W4)  # (3B,1,H4,W4)
    q_full = bilinear_resize(q_stack.reshape(3 * B, H4, W4), H, W)
    q_full = q_full.reshape(3, B, 1, H, W)
    disp_full, min_full, max_full = q_full[0], q_full[1], q_full[2]

    refined_full = bilinear_resize((refined * (W / W2)).reshape(B, H2, W2), H, W)
    refined_full = refined_full.reshape(B, 1, H, W)

    # eval branch (the second interpolation of min/max in the reference is an
    # identity resize of already full-res maps and is therefore skipped).
    disps = [refined_full, min_full, max_full,
             jnp.abs(disp_full - min_full), jnp.abs(max_full - disp_full)]
    # TODO(synk): training branch (quantile_loss + GSM loss evaluator) not implemented.
    return dict(disps=disps, costs=[None])


# ----------------------------------------------------------------------------
if __name__ == "__main__":
    key = jax.random.PRNGKey(0)
    k1, k2, k3, k4, k5 = jax.random.split(key, 5)

    B, H, W = 2, 32, 32
    D, D2 = 8, 8
    batch_left = jax.random.normal(k1, (B, 3, H, W), jnp.float32)
    batch_right = jax.random.normal(k2, (B, 3, H, W), jnp.float32)

    params = dict(
        w_bb=0.5 * jax.random.normal(k3, (8, 3), jnp.float32),     # (Cout, Cin)
        b_bb=jnp.zeros((8, 1), jnp.float32),
        w_low=0.5 * jax.random.normal(k4, (8, 3), jnp.float32),
        b_low=jnp.zeros((8, 1), jnp.float32),
        w_ref=0.1 * jax.random.normal(k5, (1, 8 + D2 + 1), jnp.float32),
        b_ref=jnp.zeros((1, 1), jnp.float32),
    )

    results = deep_pruner_forward(batch_left, batch_right, params, D=D, D2=D2)
    for d in results['disps']:
        jax.block_until_ready(d)
        assert d.shape == (B, 1, H, W)
    print("KERNEL_OK")
</pallas_src>

<mosaic_0001>
module attributes {stable_mosaic.version = 11 : i64} {
  func.func @_pointwise_conv_kernel(%arg0: i32, %arg1: i32, %arg2: memref<1x3x8x8xf32, #tpu.memory_space<vmem>>, %arg3: memref<8x3xf32, #tpu.memory_space<smem>>, %arg4: memref<8x1xf32, #tpu.memory_space<smem>>, %arg5: memref<1x8x8x8xf32, #tpu.memory_space<vmem>>) attributes {dimension_semantics = [#tpu.dimension_semantics<parallel>, #tpu.dimension_semantics<parallel>], iteration_bounds = array<i64: 2, 1>, scalar_prefetch = 0 : i64, scratch_operands = 0 : i64, tpu.core_type = #tpu.core_type<tc>, window_params = [{transform_indices = @transform_0, window_bounds = array<i64: 1, 3, 8, 8>}, {transform_indices = @transform_1, window_bounds = array<i64: 8, 3>}, {transform_indices = @transform_2, window_bounds = array<i64: 8, 1>}, {transform_indices = @transform_3, window_bounds = array<i64: 1, 8, 8, 8>}]} {
    %cst = arith.constant 0.000000e+00 : f32
    %0 = vector.broadcast %cst : f32 to vector<8x8xf32>
    %c0 = arith.constant 0 : index
    %c0_0 = arith.constant 0 : index
    %1 = memref.load %arg4[%c0, %c0_0] : memref<8x1xf32, #tpu.memory_space<smem>>
    %2 = vector.broadcast %1 : f32 to vector<8x8xf32>
    %3 = arith.addf %0, %2 : vector<8x8xf32>
    %c0_1 = arith.constant 0 : index
    %c0_2 = arith.constant 0 : index
    %c0_3 = arith.constant 0 : index
    %c0_4 = arith.constant 0 : index
    %4 = vector.load %arg2[%c0_1, %c0_2, %c0_3, %c0_4] : memref<1x3x8x8xf32, #tpu.memory_space<vmem>>, vector<1x1x8x8xf32>
    %5 = vector.shape_cast %4 : vector<1x1x8x8xf32> to vector<8x8xf32>
    %c0_5 = arith.constant 0 : index
    %c0_6 = arith.constant 0 : index
    %6 = memref.load %arg3[%c0_5, %c0_6] : memref<8x3xf32, #tpu.memory_space<smem>>
    %7 = vector.broadcast %6 : f32 to vector<8x8xf32>
    %8 = arith.mulf %5, %7 : vector<8x8xf32>
    %9 = arith.addf %3, %8 : vector<8x8xf32>
    %c0_7 = arith.constant 0 : index
    %c1 = arith.constant 1 : index
    %c0_8 = arith.constant 0 : index
    %c0_9 = arith.constant 0 : index
    %10 = vector.load %arg2[%c0_7, %c1, %c0_8, %c0_9] : memref<1x3x8x8xf32, #tpu.memory_space<vmem>>, vector<1x1x8x8xf32>
    %11 = vector.shape_cast %10 : vector<1x1x8x8xf32> to vector<8x8xf32>
    %c0_10 = arith.constant 0 : index
    %c1_11 = arith.constant 1 : index
    %12 = memref.load %arg3[%c0_10, %c1_11] : memref<8x3xf32, #tpu.memory_space<smem>>
    %13 = vector.broadcast %12 : f32 to vector<8x8xf32>
    %14 = arith.mulf %11, %13 : vector<8x8xf32>
    %15 = arith.addf %9, %14 : vector<8x8xf32>
    %c0_12 = arith.constant 0 : index
    %c2 = arith.constant 2 : index
    %c0_13 = arith.constant 0 : index
    %c0_14 = arith.constant 0 : index
    %16 = vector.load %arg2[%c0_12, %c2, %c0_13, %c0_14] : memref<1x3x8x8xf32, #tpu.memory_space<vmem>>, vector<1x1x8x8xf32>
    %17 = vector.shape_cast %16 : vector<1x1x8x8xf32> to vector<8x8xf32>
    %c0_15 = arith.constant 0 : index
    %c2_16 = arith.constant 2 : index
    %18 = memref.load %arg3[%c0_15, %c2_16] : memref<8x3xf32, #tpu.memory_space<smem>>
    %19 = vector.broadcast %18 : f32 to vector<8x8xf32>
    %20 = arith.mulf %17, %19 : vector<8x8xf32>
    %21 = arith.addf %15, %20 : vector<8x8xf32>
    %cst_17 = arith.constant 0.000000e+00 : f32
    %22 = vector.broadcast %cst_17 : f32 to vector<8x8xf32>
    %23 = arith.maximumf %21, %22 : vector<8x8xf32>
    %c0_18 = arith.constant 0 : index
    %c0_19 = arith.constant 0 : index
    %c0_20 = arith.constant 0 : index
    %c0_21 = arith.constant 0 : index
    %24 = vector.load %arg5[%c0_18, %c0_19, %c0_20, %c0_21] : memref<1x8x8x8xf32, #tpu.memory_space<vmem>>, vector<1x1x8x8xf32>
    %25 = vector.shape_cast %24 : vector<1x1x8x8xf32> to vector<8x8xf32>
    %26 = vector.shape_cast %23 : vector<8x8xf32> to vector<1x1x8x8xf32>
    tpu.vector_store %arg5[%c0_18, %c0_19, %c0_20, %c0_21], %26 {strides = array<i32>} : memref<1x8x8x8xf32, #tpu.memory_space<vmem>>, vector<1x1x8x8xf32>,
    %cst_22 = arith.constant 0.000000e+00 : f32
    %27 = vector.broadcast %cst_22 : f32 to vector<8x8xf32>
    %c1_23 = arith.constant 1 : index
    %c0_24 = arith.constant 0 : index
    %28 = memref.load %arg4[%c1_23, %c0_24] : memref<8x1xf32, #tpu.memory_space<smem>>
    %29 = vector.broadcast %28 : f32 to vector<8x8xf32>
    %30 = arith.addf %27, %29 : vector<8x8xf32>
    %c0_25 = arith.constant 0 : index
    %c0_26 = arith.constant 0 : index
    %c0_27 = arith.constant 0 : index
    %c0_28 = arith.constant 0 : index
    %31 = vector.load %arg2[%c0_25, %c0_26, %c0_27, %c0_28] : memref<1x3x8x8xf32, #tpu.memory_space<vmem>>, vector<1x1x8x8xf32>
    %32 = vector.shape_cast %31 : vector<1x1x8x8xf32> to vector<8x8xf32>
    %c1_29 = arith.constant 1 : index
    %c0_30 = arith.constant 0 : index
    %33 = memref.load %arg3[%c1_29, %c0_30] : memref<8x3xf32, #tpu.memory_space<smem>>
    %34 = vector.broadcast %33 : f32 to vector<8x8xf32>
    %35 = arith.mulf %32, %34 : vector<8x8xf32>
    %36 = arith.addf %30, %35 : vector<8x8xf32>
    %c0_31 = arith.constant 0 : index
    %c1_32 = arith.constant 1 : index
    %c0_33 = arith.constant 0 : index
    %c0_34 = arith.constant 0 : index
    %37 = vector.load %arg2[%c0_31, %c1_32, %c0_33, %c0_34] : memref<1x3x8x8xf32, #tpu.memory_space<vmem>>, vector<1x1x8x8xf32>
    %38 = vector.shape_cast %37 : vector<1x1x8x8xf32> to vector<8x8xf32>
    %c1_35 = arith.constant 1 : index
    %c1_36 = arith.constant 1 : index
    %39 = memref.load %arg3[%c1_35, %c1_36] : memref<8x3xf32, #tpu.memory_space<smem>>
    %40 = vector.broadcast %39 : f32 to vector<8x8xf32>
    %41 = arith.mulf %38, %40 : vector<8x8xf32>
    %42 = arith.addf %36, %41 : vector<8x8xf32>
    %c0_37 = arith.constant 0 : index
    %c2_38 = arith.constant 2 : index
    %c0_39 = arith.constant 0 : index
    %c0_40 = arith.constant 0 : index
    %43 = vector.load %arg2[%c0_37, %c2_38, %c0_39, %c0_40] : memref<1x3x8x8xf32, #tpu.memory_space<vmem>>, vector<1x1x8x8xf32>
    %44 = vector.shape_cast %43 : vector<1x1x8x8xf32> to vector<8x8xf32>
    %c1_41 = arith.constant 1 : index
    %c2_42 = arith.constant 2 : index
    %45 = memref.load %arg3[%c1_41, %c2_42] : memref<8x3xf32, #tpu.memory_space<smem>>
    %46 = vector.broadcast %45 : f32 to vector<8x8xf32>
    %47 = arith.mulf %44, %46 : vector<8x8xf32>
    %48 = arith.addf %42, %47 : vector<8x8xf32>
    %cst_43 = arith.constant 0.000000e+00 : f32
    %49 = vector.broadcast %cst_43 : f32 to vector<8x8xf32>
    %50 = arith.maximumf %48, %49 : vector<8x8xf32>
    %c0_44 = arith.constant 0 : index
    %c1_45 = arith.constant 1 : index
    %c0_46 = arith.constant 0 : index
    %c0_47 = arith.constant 0 : index
    %51 = vector.load %arg5[%c0_44, %c1_45, %c0_46, %c0_47] : memref<1x8x8x8xf32, #tpu.memory_space<vmem>>, vector<1x1x8x8xf32>
    %52 = vector.shape_cast %51 : vector<1x1x8x8xf32> to vector<8x8xf32>
    %53 = vector.shape_cast %50 : vector<8x8xf32> to vector<1x1x8x8xf32>
    tpu.vector_store %arg5[%c0_44, %c1_45, %c0_46, %c0_47], %53 {strides = array<i32>} : memref<1x8x8x8xf32, #tpu.memory_space<vmem>>, vector<1x1x8x8xf32>,
    %cst_48 = arith.constant 0.000000e+00 : f32
    %54 = vector.broadcast %cst_48 : f32 to vector<8x8xf32>
    %c2_49 = arith.constant 2 : index
    %c0_50 = arith.constant 0 : index
    %55 = memref.load %arg4[%c2_49, %c0_50] : memref<8x1xf32, #tpu.memory_space<smem>>
    %56 = vector.broadcast %55 : f32 to vector<8x8xf32>
    %57 = arith.addf %54, %56 : vector<8x8xf32>
    %c0_51 = arith.constant 0 : index
    %c0_52 = arith.constant 0 : index
    %c0_53 = arith.constant 0 : index
    %c0_54 = arith.constant 0 : index
    %58 = vector.load %arg2[%c0_51, %c0_52, %c0_53, %c0_54] : memref<1x3x8x8xf32, #tpu.memory_space<vmem>>, vector<1x1x8x8xf32>
    %59 = vector.shape_cast %58 : vector<1x1x8x8xf32> to vector<8x8xf32>
    %c2_55 = arith.constant 2 : index
    %c0_56 = arith.constant 0 : index
    %60 = memref.load %arg3[%c2_55, %c0_56] : memref<8x3xf32, #tpu.memory_space<smem>>
    %61 = vector.broadcast %60 : f32 to vector<8x8xf32>
    %62 = arith.mulf %59, %61 : vector<8x8xf32>
    %63 = arith.addf %57, %62 : vector<8x8xf32>
    %c0_57 = arith.constant 0 : index
    %c1_58 = arith.constant 1 : index
    %c0_59 = arith.constant 0 : index
    %c0_60 = arith.constant 0 : index
    %64 = vector.load %arg2[%c0_57, %c1_58, %c0_59, %c0_60] : memref<1x3x8x8xf32, #tpu.memory_space<vmem>>, vector<1x1x8x8xf32>
    %65 = vector.shape_cast %64 : vector<1x1x8x8xf32> to vector<8x8xf32>
    %c2_61 = arith.constant 2 : index
    %c1_62 = arith.constant 1 : index
    %66 = memref.load %arg3[%c2_61, %c1_62] : memref<8x3xf32, #tpu.memory_space<smem>>
    %67 = vector.broadcast %66 : f32 to vector<8x8xf32>
    %68 = arith.mulf %65, %67 : vector<8x8xf32>
    %69 = arith.addf %63, %68 : vector<8x8xf32>
    %c0_63 = arith.constant 0 : index
    %c2_64 = arith.constant 2 : index
    %c0_65 = arith.constant 0 : index
    %c0_66 = arith.constant 0 : index
    %70 = vector.load %arg2[%c0_63, %c2_64, %c0_65, %c0_66] : memref<1x3x8x8xf32, #tpu.memory_space<vmem>>, vector<1x1x8x8xf32>
    %71 = vector.shape_cast %70 : vector<1x1x8x8xf32> to vector<8x8xf32>
    %c2_67 = arith.constant 2 : index
    %c2_68 = arith.constant 2 : index
    %72 = memref.load %arg3[%c2_67, %c2_68] : memref<8x3xf32, #tpu.memory_space<smem>>
    %73 = vector.broadcast %72 : f32 to vector<8x8xf32>
    %74 = arith.mulf %71, %73 : vector<8x8xf32>
    %75 = arith.addf %69, %74 : vector<8x8xf32>
    %cst_69 = arith.constant 0.000000e+00 : f32
    %76 = vector.broadcast %cst_69 : f32 to vector<8x8xf32>
    %77 = arith.maximumf %75, %76 : vector<8x8xf32>
    %c0_70 = arith.constant 0 : index
    %c2_71 = arith.constant 2 : index
    %c0_72 = arith.constant 0 : index
    %c0_73 = arith.constant 0 : index
    %78 = vector.load %arg5[%c0_70, %c2_71, %c0_72, %c0_73] : memref<1x8x8x8xf32, #tpu.memory_space<vmem>>, vector<1x1x8x8xf32>
    %79 = vector.shape_cast %78 : vector<1x1x8x8xf32> to vector<8x8xf32>
    %80 = vector.shape_cast %77 : vector<8x8xf32> to vector<1x1x8x8xf32>
    tpu.vector_store %arg5[%c0_70, %c2_71, %c0_72, %c0_73], %80 {strides = array<i32>} : memref<1x8x8x8xf32, #tpu.memory_space<vmem>>, vector<1x1x8x8xf32>,
    %cst_74 = arith.constant 0.000000e+00 : f32
    %81 = vector.broadcast %cst_74 : f32 to vector<8x8xf32>
    %c3 = arith.constant 3 : index
    %c0_75 = arith.constant 0 : index
    %82 = memref.load %arg4[%c3, %c0_75] : memref<8x1xf32, #tpu.memory_space<smem>>
    %83 = vector.broadcast %82 : f32 to vector<8x8xf32>
    %84 = arith.addf %81, %83 : vector<8x8xf32>
    %c0_76 = arith.constant 0 : index
    %c0_77 = arith.constant 0 : index
    %c0_78 = arith.constant 0 : index
    %c0_79 = arith.constant 0 : index
    %85 = vector.load %arg2[%c0_76, %c0_77, %c0_78, %c0_79] : memref<1x3x8x8xf32, #tpu.memory_space<vmem>>, vector<1x1x8x8xf32>
    %86 = vector.shape_cast %85 : vector<1x1x8x8xf32> to vector<8x8xf32>
    %c3_80 = arith.constant 3 : index
    %c0_81 = arith.constant 0 : index
    %87 = memref.load %arg3[%c3_80, %c0_81] : memref<8x3xf32, #tpu.memory_space<smem>>
    %88 = vector.broadcast %87 : f32 to vector<8x8xf32>
    %89 = arith.mulf %86, %88 : vector<8x8xf32>
    %90 = arith.addf %84, %89 : vector<8x8xf32>
    %c0_82 = arith.constant 0 : index
    %c1_83 = arith.constant 1 : index
    %c0_84 = arith.constant 0 : index
    %c0_85 = arith.constant 0 : index
    %91 = vector.load %arg2[%c0_82, %c1_83, %c0_84, %c0_85] : memref<1x3x8x8xf32, #tpu.memory_space<vmem>>, vector<1x1x8x8xf32>
    %92 = vector.shape_cast %91 : vector<1x1x8x8xf32> to vector<8x8xf32>
    %c3_86 = arith.constant 3 : index
    %c1_87 = arith.constant 1 : index
    %93 = memref.load %arg3[%c3_86, %c1_87] : memref<8x3xf32, #tpu.memory_space<smem>>
    %94 = vector.broadcast %93 : f32 to vector<8x8xf32>
    %95 = arith.mulf %92, %94 : vector<8x8xf32>
    %96 = arith.addf %90, %95 : vector<8x8xf32>
    %c0_88 = arith.constant 0 : index
    %c2_89 = arith.constant 2 : index
    %c0_90 = arith.constant 0 : index
    %c0_91 = arith.constant 0 : index
    %97 = vector.load %arg2[%c0_88, %c2_89, %c0_90, %c0_91] : memref<1x3x8x8xf32, #tpu.memory_space<vmem>>, vector<1x1x8x8xf32>
    %98 = vector.shape_cast %97 : vector<1x1x8x8xf32> to vector<8x8xf32>
    %c3_92 = arith.constant 3 : index
    %c2_93 = arith.constant 2 : index
    %99 = memref.load %arg3[%c3_92, %c2_93] : memref<8x3xf32, #tpu.memory_space<smem>>
    %100 = vector.broadcast %99 : f32 to vector<8x8xf32>
    %101 = arith.mulf %98, %100 : vector<8x8xf32>
    %102 = arith.addf %96, %101 : vector<8x8xf32>
    %cst_94 = arith.constant 0.000000e+00 : f32
    %103 = vector.broadcast %cst_94 : f32 to vector<8x8xf32>
    %104 = arith.maximumf %102, %103 : vector<8x8xf32>
    %c0_95 = arith.constant 0 : index
    %c3_96 = arith.constant 3 : index
    %c0_97 = arith.constant 0 : index
    %c0_98 = arith.constant 0 : index
    %105 = vector.load %arg5[%c0_95, %c3_96, %c0_97, %c0_98] : memref<1x8x8x8xf32, #tpu.memory_space<vmem>>, vector<1x1x8x8xf32>
    %106 = vector.shape_cast %105 : vector<1x1x8x8xf32> to vector<8x8xf32>
    %107 = vector.shape_cast %104 : vector<8x8xf32> to vector<1x1x8x8xf32>
    tpu.vector_store %arg5[%c0_95, %c3_96, %c0_97, %c0_98], %107 {strides = array<i32>} : memref<1x8x8x8xf32, #tpu.memory_space<vmem>>, vector<1x1x8x8xf32>,
    %cst_99 = arith.constant 0.000000e+00 : f32
    %108 = vector.broadcast %cst_99 : f32 to vector<8x8xf32>
    %c4 = arith.constant 4 : index
    %c0_100 = arith.constant 0 : index
    %109 = memref.load %arg4[%c4, %c0_100] : memref<8x1xf32, #tpu.memory_space<smem>>
    %110 = vector.broadcast %109 : f32 to vector<8x8xf32>
    %111 = arith.addf %108, %110 : vector<8x8xf32>
    %c0_101 = arith.constant 0 : index
    %c0_102 = arith.constant 0 : index
    %c0_103 = arith.constant 0 : index
    %c0_104 = arith.constant 0 : index
    %112 = vector.load %arg2[%c0_101, %c0_102, %c0_103, %c0_104] : memref<1x3x8x8xf32, #tpu.memory_space<vmem>>, vector<1x1x8x8xf32>
    %113 = vector.shape_cast %112 : vector<1x1x8x8xf32> to vector<8x8xf32>
    %c4_105 = arith.constant 4 : index
    %c0_106 = arith.constant 0 : index
    %114 = memref.load %arg3[%c4_105, %c0_106] : memref<8x3xf32, #tpu.memory_space<smem>>
    %115 = vector.broadcast %114 : f32 to vector<8x8xf32>
    %116 = arith.mulf %113, %115 : vector<8x8xf32>
    %117 = arith.addf %111, %116 : vector<8x8xf32>
    %c0_107 = arith.constant 0 : index
    %c1_108 = arith.constant 1 : index
    %c0_109 = arith.constant 0 : index
    %c0_110 = arith.constant 0 : index
    %118 = vector.load %arg2[%c0_107, %c1_108, %c0_109, %c0_110] : memref<1x3x8x8xf32, #tpu.memory_space<vmem>>, vector<1x1x8x8xf32>
    %119 = vector.shape_cast %118 : vector<1x1x8x8xf32> to vector<8x8xf32>
    %c4_111 = arith.constant 4 : index
    %c1_112 = arith.constant 1 : index
    %120 = memref.load %arg3[%c4_111, %c1_112] : memref<8x3xf32, #tpu.memory_space<smem>>
    %121 = vector.broadcast %120 : f32 to vector<8x8xf32>
    %122 = arith.mulf %119, %121 : vector<8x8xf32>
    %123 = arith.addf %117, %122 : vector<8x8xf32>
    %c0_113 = arith.constant 0 : index
    %c2_114 = arith.constant 2 : index
    %c0_115 = arith.constant 0 : index
    %c0_116 = arith.constant 0 : index
    %124 = vector.load %arg2[%c0_113, %c2_114, %c0_115, %c0_116] : memref<1x3x8x8xf32, #tpu.memory_space<vmem>>, vector<1x1x8x8xf32>
    %125 = vector.shape_cast %124 : vector<1x1x8x8xf32> to vector<8x8xf32>
    %c4_117 = arith.constant 4 : index
    %c2_118 = arith.constant 2 : index
    %126 = memref.load %arg3[%c4_117, %c2_118] : memref<8x3xf32, #tpu.memory_space<smem>>
    %127 = vector.broadcast %126 : f32 to vector<8x8xf32>
    %128 = arith.mulf %125, %127 : vector<8x8xf32>
    %129 = arith.addf %123, %128 : vector<8x8xf32>
    %cst_119 = arith.constant 0.000000e+00 : f32
    %130 = vector.broadcast %cst_119 : f32 to vector<8x8xf32>
    %131 = arith.maximumf %129, %130 : vector<8x8xf32>
    %c0_120 = arith.constant 0 : index
    %c4_121 = arith.constant 4 : index
    %c0_122 = arith.constant 0 : index
    %c0_123 = arith.constant 0 : index
    %132 = vector.load %arg5[%c0_120, %c4_121, %c0_122, %c0_123] : memref<1x8x8x8xf32, #tpu.memory_space<vmem>>, vector<1x1x8x8xf32>
    %133 = vector.shape_cast %132 : vector<1x1x8x8xf32> to vector<8x8xf32>
    %134 = vector.shape_cast %131 : vector<8x8xf32> to vector<1x1x8x8xf32>
    tpu.vector_store %arg5[%c0_120, %c4_121, %c0_122, %c0_123], %134 {strides = array<i32>} : memref<1x8x8x8xf32, #tpu.memory_space<vmem>>, vector<1x1x8x8xf32>,
    %cst_124 = arith.constant 0.000000e+00 : f32
    %135 = vector.broadcast %cst_124 : f32 to vector<8x8xf32>
    %c5 = arith.constant 5 : index
    %c0_125 = arith.constant 0 : index
    %136 = memref.load %arg4[%c5, %c0_125] : memref<8x1xf32, #tpu.memory_space<smem>>
    %137 = vector.broadcast %136 : f32 to vector<8x8xf32>
    %138 = arith.addf %135, %137 : vector<8x8xf32>
    %c0_126 = arith.constant 0 : index
    %c0_127 = arith.constant 0 : index
    %c0_128 = arith.constant 0 : index
    %c0_129 = arith.constant 0 : index
    %139 = vector.load %arg2[%c0_126, %c0_127, %c0_128, %c0_129] : memref<1x3x8x8xf32, #tpu.memory_space<vmem>>, vector<1x1x8x8xf32>
    %140 = vector.shape_cast %139 : vector<1x1x8x8xf32> to vector<8x8xf32>
    %c5_130 = arith.constant 5 : index
    %c0_131 = arith.constant 0 : index
    %141 = memref.load %arg3[%c5_130, %c0_131] : memref<8x3xf32, #tpu.memory_space<smem>>
    %142 = vector.broadcast %141 : f32 to vector<8x8xf32>
    %143 = arith.mulf %140, %142 : vector<8x8xf32>
    %144 = arith.addf %138, %143 : vector<8x8xf32>
    %c0_132 = arith.constant 0 : index
    %c1_133 = arith.constant 1 : index
    %c0_134 = arith.constant 0 : index
    %c0_135 = arith.constant 0 : index
    %145 = vector.load %arg2[%c0_132, %c1_133, %c0_134, %c0_135] : memref<1x3x8x8xf32, #tpu.memory_space<vmem>>, vector<1x1x8x8xf32>
    %146 = vector.shape_cast %145 : vector<1x1x8x8xf32> to vector<8x8xf32>
    %c5_136 = arith.constant 5 : index
    %c1_137 = arith.constant 1 : index
    %147 = memref.load %arg3[%c5_136, %c1_137] : memref<8x3xf32, #tpu.memory_space<smem>>
    %148 = vector.broadcast %147 : f32 to vector<8x8xf32>
    %149 = arith.mulf %146, %148 : vector<8x8xf32>
    %150 = arith.addf %144, %149 : vector<8x8xf32>
    %c0_138 = arith.constant 0 : index
    %c2_139 = arith.constant 2 : index
    %c0_140 = arith.constant 0 : index
    %c0_141 = arith.constant 0 : index
    %151 = vector.load %arg2[%c0_138, %c2_139, %c0_140, %c0_141] : memref<1x3x8x8xf32, #tpu.memory_space<vmem>>, vector<1x1x8x8xf32>
    %152 = vector.shape_cast %151 : vector<1x1x8x8xf32> to vector<8x8xf32>
    %c5_142 = arith.constant 5 : index
    %c2_143 = arith.constant 2 : index
    %153 = memref.load %arg3[%c5_142, %c2_143] : memref<8x3xf32, #tpu.memory_space<smem>>
    %154 = vector.broadcast %153 : f32 to vector<8x8xf32>
    %155 = arith.mulf %152, %154 : vector<8x8xf32>
    %156 = arith.addf %150, %155 : vector<8x8xf32>
    %cst_144 = arith.constant 0.000000e+00 : f32
    %157 = vector.broadcast %cst_144 : f32 to vector<8x8xf32>
    %158 = arith.maximumf %156, %157 : vector<8x8xf32>
    %c0_145 = arith.constant 0 : index
    %c5_146 = arith.constant 5 : index
    %c0_147 = arith.constant 0 : index
    %c0_148 = arith.constant 0 : index
    %159 = vector.load %arg5[%c0_145, %c5_146, %c0_147, %c0_148] : memref<1x8x8x8xf32, #tpu.memory_space<vmem>>, vector<1x1x8x8xf32>
    %160 = vector.shape_cast %159 : vector<1x1x8x8xf32> to vector<8x8xf32>
    %161 = vector.shape_cast %158 : vector<8x8xf32> to vector<1x1x8x8xf32>
    tpu.vector_store %arg5[%c0_145, %c5_146, %c0_147, %c0_148], %161 {strides = array<i32>} : memref<1x8x8x8xf32, #tpu.memory_space<vmem>>, vector<1x1x8x8xf32>,
    %cst_149 = arith.constant 0.000000e+00 : f32
    %162 = vector.broadcast %cst_149 : f32 to vector<8x8xf32>
    %c6 = arith.constant 6 : index
    %c0_150 = arith.constant 0 : index
    %163 = memref.load %arg4[%c6, %c0_150] : memref<8x1xf32, #tpu.memory_space<smem>>
    %164 = vector.broadcast %163 : f32 to vector<8x8xf32>
    %165 = arith.addf %162, %164 : vector<8x8xf32>
    %c0_151 = arith.constant 0 : index
    %c0_152 = arith.constant 0 : index
    %c0_153 = arith.constant 0 : index
    %c0_154 = arith.constant 0 : index
    %166 = vector.load %arg2[%c0_151, %c0_152, %c0_153, %c0_154] : memref<1x3x8x8xf32, #tpu.memory_space<vmem>>, vector<1x1x8x8xf32>
    %167 = vector.shape_cast %166 : vector<1x1x8x8xf32> to vector<8x8xf32>
    %c6_155 = arith.constant 6 : index
    %c0_156 = arith.constant 0 : index
    %168 = memref.load %arg3[%c6_155, %c0_156] : memref<8x3xf32, #tpu.memory_space<smem>>
    %169 = vector.broadcast %168 : f32 to vector<8x8xf32>
    %170 = arith.mulf %167, %169 : vector<8x8xf32>
    %171 = arith.addf %165, %170 : vector<8x8xf32>
    %c0_157 = arith.constant 0 : index
    %c1_158 = arith.constant 1 : index
    %c0_159 = arith.constant 0 : index
    %c0_160 = arith.constant 0 : index
    %172 = vector.load %arg2[%c0_157, %c1_158, %c0_159, %c0_160] : memref<1x3x8x8xf32, #tpu.memory_space<vmem>>, vector<1x1x8x8xf32>
    %173 = vector.shape_cast %172 : vector<1x1x8x8xf32> to vector<8x8xf32>
    %c6_161 = arith.constant 6 : index
    %c1_162 = arith.constant 1 : index
    %174 = memref.load %arg3[%c6_161, %c1_162] : memref<8x3xf32, #tpu.memory_space<smem>>
    %175 = vector.broadcast %174 : f32 to vector<8x8xf32>
    %176 = arith.mulf %173, %175 : vector<8x8xf32>
    %177 = arith.addf %171, %176 : vector<8x8xf32>
    %c0_163 = arith.constant 0 : index
    %c2_164 = arith.constant 2 : index
    %c0_165 = arith.constant 0 : index
    %c0_166 = arith.constant 0 : index
    %178 = vector.load %arg2[%c0_163, %c2_164, %c0_165, %c0_166] : memref<1x3x8x8xf32, #tpu.memory_space<vmem>>, vector<1x1x8x8xf32>
    %179 = vector.shape_cast %178 : vector<1x1x8x8xf32> to vector<8x8xf32>
    %c6_167 = arith.constant 6 : index
    %c2_168 = arith.constant 2 : index
    %180 = memref.load %arg3[%c6_167, %c2_168] : memref<8x3xf32, #tpu.memory_space<smem>>
    %181 = vector.broadcast %180 : f32 to vector<8x8xf32>
    %182 = arith.mulf %179, %181 : vector<8x8xf32>
    %183 = arith.addf %177, %182 : vector<8x8xf32>
    %cst_169 = arith.constant 0.000000e+00 : f32
    %184 = vector.broadcast %cst_169 : f32 to vector<8x8xf32>
    %185 = arith.maximumf %183, %184 : vector<8x8xf32>
    %c0_170 = arith.constant 0 : index
    %c6_171 = arith.constant 6 : index
    %c0_172 = arith.constant 0 : index
    %c0_173 = arith.constant 0 : index
    %186 = vector.load %arg5[%c0_170, %c6_171, %c0_172, %c0_173] : memref<1x8x8x8xf32, #tpu.memory_space<vmem>>, vector<1x1x8x8xf32>
    %187 = vector.shape_cast %186 : vector<1x1x8x8xf32> to vector<8x8xf32>
    %188 = vector.shape_cast %185 : vector<8x8xf32> to vector<1x1x8x8xf32>
    tpu.vector_store %arg5[%c0_170, %c6_171, %c0_172, %c0_173], %188 {strides = array<i32>} : memref<1x8x8x8xf32, #tpu.memory_space<vmem>>, vector<1x1x8x8xf32>,
    %cst_174 = arith.constant 0.000000e+00 : f32
    %189 = vector.broadcast %cst_174 : f32 to vector<8x8xf32>
    %c7 = arith.constant 7 : index
    %c0_175 = arith.constant 0 : index
    %190 = memref.load %arg4[%c7, %c0_175] : memref<8x1xf32, #tpu.memory_space<smem>>
    %191 = vector.broadcast %190 : f32 to vector<8x8xf32>
    %192 = arith.addf %189, %191 : vector<8x8xf32>
    %c0_176 = arith.constant 0 : index
    %c0_177 = arith.constant 0 : index
    %c0_178 = arith.constant 0 : index
    %c0_179 = arith.constant 0 : index
    %193 = vector.load %arg2[%c0_176, %c0_177, %c0_178, %c0_179] : memref<1x3x8x8xf32, #tpu.memory_space<vmem>>, vector<1x1x8x8xf32>
    %194 = vector.shape_cast %193 : vector<1x1x8x8xf32> to vector<8x8xf32>
    %c7_180 = arith.constant 7 : index
    %c0_181 = arith.constant 0 : index
    %195 = memref.load %arg3[%c7_180, %c0_181] : memref<8x3xf32, #tpu.memory_space<smem>>
    %196 = vector.broadcast %195 : f32 to vector<8x8xf32>
    %197 = arith.mulf %194, %196 : vector<8x8xf32>
    %198 = arith.addf %192, %197 : vector<8x8xf32>
    %c0_182 = arith.constant 0 : index
    %c1_183 = arith.constant 1 : index
    %c0_184 = arith.constant 0 : index
    %c0_185 = arith.constant 0 : index
    %199 = vector.load %arg2[%c0_182, %c1_183, %c0_184, %c0_185] : memref<1x3x8x8xf32, #tpu.memory_space<vmem>>, vector<1x1x8x8xf32>
    %200 = vector.shape_cast %199 : vector<1x1x8x8xf32> to vector<8x8xf32>
    %c7_186 = arith.constant 7 : index
    %c1_187 = arith.constant 1 : index
    %201 = memref.load %arg3[%c7_186, %c1_187] : memref<8x3xf32, #tpu.memory_space<smem>>
    %202 = vector.broadcast %201 : f32 to vector<8x8xf32>
    %203 = arith.mulf %200, %202 : vector<8x8xf32>
    %204 = arith.addf %198, %203 : vector<8x8xf32>
    %c0_188 = arith.constant 0 : index
    %c2_189 = arith.constant 2 : index
    %c0_190 = arith.constant 0 : index
    %c0_191 = arith.constant 0 : index
    %205 = vector.load %arg2[%c0_188, %c2_189, %c0_190, %c0_191] : memref<1x3x8x8xf32, #tpu.memory_space<vmem>>, vector<1x1x8x8xf32>
    %206 = vector.shape_cast %205 : vector<1x1x8x8xf32> to vector<8x8xf32>
    %c7_192 = arith.constant 7 : index
    %c2_193 = arith.constant 2 : index
    %207 = memref.load %arg3[%c7_192, %c2_193] : memref<8x3xf32, #tpu.memory_space<smem>>
    %208 = vector.broadcast %207 : f32 to vector<8x8xf32>
    %209 = arith.mulf %206, %208 : vector<8x8xf32>
    %210 = arith.addf %204, %209 : vector<8x8xf32>
    %cst_194 = arith.constant 0.000000e+00 : f32
    %211 = vector.broadcast %cst_194 : f32 to vector<8x8xf32>
    %212 = arith.maximumf %210, %211 : vector<8x8xf32>
    %c0_195 = arith.constant 0 : index
    %c7_196 = arith.constant 7 : index
    %c0_197 = arith.constant 0 : index
    %c0_198 = arith.constant 0 : index
    %213 = vector.load %arg5[%c0_195, %c7_196, %c0_197, %c0_198] : memref<1x8x8x8xf32, #tpu.memory_space<vmem>>, vector<1x1x8x8xf32>
    %214 = vector.shape_cast %213 : vector<1x1x8x8xf32> to vector<8x8xf32>
    %215 = vector.shape_cast %212 : vector<8x8xf32> to vector<1x1x8x8xf32>
    tpu.vector_store %arg5[%c0_195, %c7_196, %c0_197, %c0_198], %215 {strides = array<i32>} : memref<1x8x8x8xf32, #tpu.memory_space<vmem>>, vector<1x1x8x8xf32>,
    return
  }
  func.func @transform_0(%arg0: i32, %arg1: i32) -> (i32, i32, i32, i32) {
    %c0_i32 = arith.constant 0 : i32
    %c0_i32_0 = arith.constant 0 : i32
    %c0_i32_1 = arith.constant 0 : i32
    return %arg0, %c0_i32, %arg1, %c0_i32_0 : i32, i32, i32, i32
  }
  func.func @transform_1(%arg0: i32, %arg1: i32) -> (i32, i32) {
    %c0_i32 = arith.constant 0 : i32
    %c0_i32_0 = arith.constant 0 : i32
    %c0_i32_1 = arith.constant 0 : i32
    return %c0_i32, %c0_i32_0 : i32, i32
  }
  func.func @transform_2(%arg0: i32, %arg1: i32) -> (i32, i32) {
    %c0_i32 = arith.constant 0 : i32
    %c0_i32_0 = arith.constant 0 : i32
    %c0_i32_1 = arith.constant 0 : i32
    return %c0_i32, %c0_i32_0 : i32, i32
  }
  func.func @transform_3(%arg0: i32, %arg1: i32) -> (i32, i32, i32, i32) {
    %c0_i32 = arith.constant 0 : i32
    %c0_i32_0 = arith.constant 0 : i32
    %c0_i32_1 = arith.constant 0 : i32
    return %arg0, %c0_i32, %arg1, %c0_i32_0 : i32, i32, i32, i32
  }
}

</mosaic_0001>

<bundles_post_ra>
// kernel: tpu_custom_call.1
= control target key start
LH: loop header
LB: loop body
LE: loop exit
PB: predicated region body
PF: predicated region fallthrough
CT: control target
= control target key end

     0   :  { %s1213_s0 = inlined_call_operand.hbm [shape: f32[2,3,8,8], index: 0, kind: input, shape index: {}]   ;;  %s1214_s1 = inlined_call_operand.vmem [shape: f32[8,3], index: 1, kind: input, shape index: {}]   ;;  %s1215_s2 = inlined_call_operand.vmem [shape: f32[8,1], index: 2, kind: input, shape index: {}]   ;;  %s1216_s3 = inlined_call_operand.hbm [shape: f32[2,8,8,8], index: 3, kind: output, shape index: {}]  }
   0x1   :  { %1223 = sst [smem:[#allocation14_spill]] %s1213_s0 }
   0x2   :  { %8 = vsyncpa [#allocation3], 0 }
   0x3   :  { %10 = vsyncpa [#allocation3 + $0x1], 0 }
   0x4   :  { %11 = vsyncpa [#allocation5], 0 }
   0x5   :  { %12 = vsyncpa [#allocation8], 0 }
   0x6   :  { %13 = vsyncpa [#allocation4], 0 }
   0x7   :  { %15 = vsyncpa [#allocation4 + $0x1], 0  ;;  %s865_s12 = smov 0   ;;  %s867_s13 = smov 0  }
   0x8   :  { %s869_s14 = smov 0   ;;  %s871_s15 = smov 0  }
   0x9   :  { %s873_s16 = smov 0   ;;  %s875_s17 = smov 0  }
   0xa LB: > { %s525_s18 = sadd.s32 4294967295, %s835_s17   ;;  %s526_s19 = sadd.s32 4294967294, %s835_s17   ;;  %s835_s17 = sphi %s875_s17, %s21_s17   ;;  %s831_s16 = sphi %s873_s16, %s1245_s16   ;;  %s827_s15 = sphi %s871_s15, %s1244_s15   ;;  %s823_s14 = sphi %s869_s14, %s1243_s14   ;;  %s819_s13 = sphi %s867_s13, %s1242_s13   ;;  %s815_s12 = sphi %s865_s12, %s1241_s12  }
   0xb   : > { %s42_s20 = sadd.s32 1, %s823_s14  ;;  %p49_p0 = scmp.ne.s32.totalorder %s823_s14, %s819_s13 }
   0xc   : > { %p50_p1 = scmp.eq.s32.totalorder %s835_s17, 0  ;;  %p55_p2 = scmp.ne.s32.totalorder %s819_s13, %s815_s12 }
   0xd   : > { %p903_p3 = scmp.eq.s32.totalorder %s525_s18, 0  ;;  %p123_p4 = scmp.eq.s32.totalorder %s525_s18, 1 }
   0xe   : > { %p907_p5 = por %p50_p1, %p49_p0  ;;  %p129_p6 = scmp.eq.s32.totalorder %s526_s19, 1 }
   0xf   : > { %s1224_s21 = scalar_select %p903_p3, 1, 0 }
  0x10   : > { %p913_p7 = por %p903_p3, %p55_p2  ;;  %p917_p8 = por %p123_p4, %p49_p0 }
  0x11   : > { %p921_p9 = por %p129_p6, %p55_p2  ;;  %p527_p10 = scmp.ge.s32.totalorder %s835_s17, 1 }
  0x12   : > { %s1226_s23 = scalar_select %p913_p7, 1, 0 }
  0x13   : > { %s1227_s24 = scalar_select %p917_p8, 1, 0 }
  0x14   : > { %s1228_s25 = scalar_select %p921_p9, 1, 0 }
  0x15   : > { %p136_p11 = scmp.lt.s32.totalorder %s835_s17, 3  ;;  %s149_s28 = sshll.u32 %s1214_s1, 4  ;;  %s150_s28 = int_to_ptr.vmem [resolvable:$true] %s149_s28 }
  0x16   : > { %p627_p0 = scmp.lt.s32.totalorder %s835_s17, 2  ;;  %s160_s5 = sshll.u32 %s1215_s2, 4  ;;  %s161_s5 = int_to_ptr.vmem [resolvable:$true] %s160_s5 }
  0x17   : > { %p930_p12 = pnand %p527_p10, %p136_p11  ;;  %s685_s8 = scalar_lea.vmem %s150_s28, 128 }
  0x18   : > { %p943_p2 = pnand %p627_p0, %p907_p5  ;;  %p686_p6 = scmp.ne.s32.totalorder %s150_s28, %s685_s8 }
  0x19   : > { %s1229_s29 = scalar_select %p930_p12, 1, 0 }
  0x1a   : > { %p610_p1 = pneg %p930_p12  ;;  %p693_p9 = scmp.lt.s32.totalorder %s150_s28, %s150_s28 }
  0x1b   : > { %s1230_s6 = scalar_select %p943_p2, 1, 0 }
  0x1c   : > { %p949_p4 = pnand %p610_p1, %p903_p3  ;;  %p694_p8 = scmp.lt.s32.totalorder %s685_s8, %s685_s8 }
  0x1e   : > { %p687_p10 = pneg %p949_p4  ;;  %p695_p7 = por %p694_p8, %p693_p9 }
  0x20   : > { %p688_p11 = pnand %p687_p10, %p686_p6 }
  0x22   : > { %p689_p13 = pneg %p688_p11 }
  0x24   : > { %p696_p5 = pnand %p695_p7, %p689_p13 }
  0x26   : > { %699 = shalt.err (!%p696_p5)
}
  0x27   : > { %s837_s9 = smov [#allocation6]   ;;  %s700_s10 = scalar_lea.vmem %s161_s5, 128 }
  0x28   : > { %613 = dma.vmem_to_smem (!%p949_p4), %s150_s28, 128, %s837_s9, [#allocation5]  }
  0x29   : > { %p701_p0 = scmp.ne.s32.totalorder %s161_s5, %s700_s10  ;;  %p708_p12 = scmp.lt.s32.totalorder %s161_s5, %s161_s5 }
  0x2a   : > { %p709_p2 = scmp.lt.s32.totalorder %s700_s10, %s700_s10 }
  0x2b   : > { %p703_p1 = pnand %p701_p0, %p687_p10 }
  0x2c   : > { %p710_p6 = por %p709_p2, %p708_p12 }
  0x2d   : > { %p704_p3 = pneg %p703_p1 }
  0x2f   : > { %p711_p11 = pnand %p710_p6, %p704_p3 }
  0x31   : > { %714 = shalt.err (!%p711_p11)
}
  0x32   : > { %s838_s11 = smov [#allocation7]   ;;  %s33_s18 = sadd.s32 1, %s831_s16 }
  0x33   : > { %616 = dma.vmem_to_smem (!%p949_p4), %s161_s5, 128, %s838_s11, [#allocation8]  }
  0x34   : > { %s171_s19 = sand.u32 1, %s823_s14   ;;  %p35_p7 = scmp.ge.s32.totalorder %s33_s18, 2 }
  0x35   : > { %s595_s22 = smul.u32 24, %s171_s19  ;;  %s1232_s0 = sld [smem:[#allocation14_spill]] }
  0x36   : > { %s1247_s18 = smov (%p35_p7, %s33_s18), 0  ;;  %s596_s26 = smul.u32 384, %s831_s16 }
  0x37   : > { %s37_s27 = ssub.s32 %s831_s16, %s1247_s18  ;;  %s175_s28 = scalar_lea.vmem [#allocation2], %s595_s22 }
  0x38   : > { %s183_s30 = sshll.u32 %s175_s28, 4  ;;  %p40_p3 = scmp.eq.s32.totalorder %s37_s27, 0  ;;  %s971_s30 = int_to_ptr.vmem [resolvable:$true] %s183_s30 }
  0x39   : > { %s978_s9 = scalar_lea.sflag [#allocation3], %s171_s19  ;;  %p1233_p9 = scmp.ne.s32.totalorder %s1230_s6, 0 }
  0x3a   : > { %s976_s5 = scalar_select %p40_p3, %s823_s14, %s42_s20  }
  0x3b   : > { %s969_s8 = scalar_lea.hbm %s1232_s0, %s596_s26  ;;  %p717_p12 = pneg %p1233_p9 }
  0x3c   : > { %s715_s10 = scalar_lea.hbm %s969_s8, 384  ;;  %s720_s26 = scalar_lea.hbm %s1232_s0, 768 }
  0x3d   : > { %p716_p8 = scmp.ne.s32.totalorder %s969_s8, %s715_s10  ;;  %p721_p4 = scmp.lt.u32.totalorder %s969_s8, %s1232_s0 }
  0x3e   : > { %p722_p10 = scmp.lt.u32.totalorder %s720_s26, %s715_s10  ;;  %p724_p0 = scmp.lt.u32.totalorder %s715_s10, %s969_s8 }
  0x3f   : > { %p718_p13 = pnand %p717_p12, %p716_p8 }
  0x40   : > { %p723_p5 = por %p722_p10, %p721_p4 }
  0x41   : > { %p719_p2 = pneg %p718_p13 }
  0x42   : > { %p725_p1 = por %p724_p0, %p723_p5 }
  0x44   : > { %p726_p6 = pnand %p725_p1, %p719_p2 }
  0x46   : > { %729 = shalt.err (!%p726_p6)
}
  0x47   : > { %s730_s20 = scalar_lea.vmem %s971_s30, 384  ;;  %s839_s19 = smov [#allocation2]  }
  0x48   : > { %p731_p11 = scmp.ne.s32.totalorder %s971_s30, %s730_s20  ;;  %s735_s4 = sshll.u32 %s839_s19, 4  ;;  %s736_s4 = int_to_ptr.vmem [resolvable:$false] %s735_s4 }
  0x49   : > { %s737_s7 = scalar_lea.vmem %s736_s4, 768  ;;  %p738_p8 = scmp.lt.s32.totalorder %s971_s30, %s736_s4 }
  0x4a   : > { %p733_p7 = pnand %p731_p11, %p717_p12  ;;  %p739_p13 = scmp.lt.s32.totalorder %s737_s7, %s730_s20 }
  0x4c   : > { %p734_p3 = pneg %p733_p7  ;;  %p740_p4 = por %p739_p13, %p738_p8 }
  0x4e   : > { %p741_p10 = pnand %p740_p4, %p734_p3 }
  0x50   : > { %744 = shalt.err (!%p741_p10)
}
  0x51   : > { %s840_s10 = smov 128   ;;  %s841_s11 = smov 8  }
  0x52   : > { %620 = dma.hbm_to_vmem [thread:$0]  (!%p1233_p9), %s969_s8, 384, %s971_s30, %s978_s9, %s840_s10, %s840_s10, %s841_s11  }
  0x53   : > { %p1234_p12 = scmp.ne.s32.totalorder %s1229_s29, 0 }
  0x54   : > { %s1009_s22 = sand.u32 (!%p1234_p12), 1, %s819_s13   ;;  %p1235_p2 = scmp.ne.s32.totalorder (!%p1234_p12), %s1226_s23, 0 }
  0x55   : > { %195 = sbr.rel (%p1234_p12) target bundleno = 150 (0x96), region = 32  ;;  %s198_s27 = scalar_lea.sflag (!%p1234_p12), [#allocation3], %s1009_s22 }
  0x56   : > { %s597_s26 = smul.u32 (!%p1234_p12), 24, %s1009_s22 }
  0x58   : > { %s201_s28 = scalar_lea.vmem (!%p1234_p12), [#allocation2], %s597_s26 }
  0x5c   : > { %798 = dma.done.wait (%p1235_p2), %s198_s27, 384  }
  0x5d   : > { %800 = vsyncadd (%p1235_p2), %s198_s27, 4294966912  ;;  %p1236_p5 = scmp.ne.s32.totalorder %s1224_s21, 0 }
  0x5f   : > { %802 = dma.done.wait (%p1236_p5), [#allocation5], 128  }
  0x60   : > { %804 = vsyncadd (%p1236_p5), [#allocation5], 4294967168 }
  0x61   : > { %806 = dma.done.wait (%p1236_p5), [#allocation8], 128  }
  0x62   : > { %808 = vsyncadd (%p1236_p5), [#allocation8], 4294967168 }
  0x63   : > { %214 = sfence }
  0x64   : > { %s233_s29 = sld [smem:[#allocation7]]  ;;  %s537_s30 = sld [smem:[#allocation6 + $0x1]]  ;;  %v1028_v0 = vld [vmem:[%s201_s28] sm:$0xff]  ;;  %v1034_v1 = vld [vmem:[%s201_s28 + $0x8] sm:$0xff]  ;;  %v1040_v4 = vld [vmem:[%s201_s28 + $0x10] sm:$0xff]  ;;  %vm254_vm0 = vcmask 64512  }
  0x65   : > { %s237_s6 = sld [smem:[#allocation6]]  ;;  %s539_s8 = sld [smem:[#allocation6 + $0x2]] }
  0x66   : > { %s1025_s23 = sld [smem:[#allocation7 + $0x80]]  ;;  %s1030_s19 = sld [smem:[#allocation6 + $0x81]] }
  0x67   : > { %s541_s20 = sld [smem:[#allocation6 + $0x80]]  ;;  %s1032_s4 = sld [smem:[#allocation6 + $0x82]] }
  0x68   : > { %s1036_s21 = sld [smem:[#allocation7 + $0x100]]  ;;  %s1042_s10 = sld [smem:[#allocation6 + $0x101]] }
  0x69   : > { %s1038_s7 = sld [smem:[#allocation6 + $0x100]]  ;;  %s1044_s11 = sld [smem:[#allocation6 + $0x102]] }
  0x6a   : > { %v234_v2 = vstv %s233_s29  ;;  %v244_v6 = vstv %s537_s30  ;;  %s1047_s26 = sld [smem:[#allocation7 + $0x180]]  ;;  %s1052_s29 = sld [smem:[#allocation6 + $0x181]] }
  0x6b   : > { %v238_v3 = vstv %s237_s6  ;;  %v250_v7 = vstv %s539_s8  ;;  %s1049_s27 = sld [smem:[#allocation6 + $0x180]]  ;;  %v245_v8 = vmul.f32 %v1034_v1, %v244_v6  ;;  %s1054_s28 = sld [smem:[#allocation6 + $0x182]] }
  0x6c   : > { %v239_v5 = vmul.f32 %v238_v3, %v1028_v0  ;;  %v251_v10 = vmul.f32 %v1040_v4, %v250_v7  ;;  %v257_v11 = vstv %s1025_s23  ;;  %s1058_s6 = sld [smem:[#allocation7 + $0x200]]  ;;  %v266_v14 = vstv %s1030_s19  ;;  %s1065_s8 = sld [smem:[#allocation6 + $0x201]] }
  0x6d   : > { %v261_v12 = vstv %s541_s20  ;;  %s1060_s30 = sld [smem:[#allocation6 + $0x200]]  ;;  %v271_v15 = vstv %s1032_s4  ;;  %s1067_s9 = sld [smem:[#allocation6 + $0x202]]  ;;  %v267_v17 = vmul.f32 %v1034_v1, %v266_v14 }
  0x6e   : > { %v240_v9 = vadd.f32 %v239_v5, %v234_v2  ;;  %v262_v13 = vmul.f32 %v261_v12, %v1028_v0  ;;  %v272_v18 = vmul.f32 %v1040_v4, %v271_v15  ;;  %v278_v19 = vstv %s1036_s21  ;;  %s1072_s23 = sld [smem:[#allocation7 + $0x280]]  ;;  %s1079_s19 = sld [smem:[#allocation6 + $0x281]] }
  0x6f   : > { %s1074_s20 = sld [smem:[#allocation6 + $0x280]]  ;;  %v282_v21 = vstv %s1038_s7  ;;  %v287_v22 = vstv %s1042_s10  ;;  %v292_v23 = vstv %s1044_s11  ;;  %s1081_s4 = sld [smem:[#allocation6 + $0x282]] }
  0x70   : > { %v246_v16 = vadd.f32 %v245_v8, %v240_v9  ;;  %v263_v20 = vadd.f32 %v262_v13, %v257_v11  ;;  %v283_v25 = vmul.f32 %v282_v21, %v1028_v0  ;;  %v288_v26 = vmul.f32 %v1034_v1, %v287_v22  ;;  %s1089_s21 = sld [smem:[#allocation7 + $0x300]]  ;;  %s1095_s10 = sld [smem:[#allocation6 + $0x301]] }
  0x71   : > { %v293_v27 = vmul.f32 %v1040_v4, %v292_v23  ;;  %v299_v29 = vstv %s1047_s26  ;;  %v303_v30 = vstv %s1049_s27  ;;  %v308_v31 = vstv %s1052_s29  ;;  %s1091_s7 = sld [smem:[#allocation6 + $0x300]]  ;;  %s1097_s11 = sld [smem:[#allocation6 + $0x302]] }
  0x72   : > { %v252_v24 = vadd.f32 %v251_v10, %v246_v16  ;;  %v268_v28 = vadd.f32 %v267_v17, %v263_v20  ;;  %v284_v33 = vadd.f32 %v283_v25, %v278_v19  ;;  %v304_v34 = vmul.f32 %v303_v30, %v1028_v0  ;;  %s1102_s26 = sld [smem:[#allocation7 + $0x380]]  ;;  %s1237_s29 = sshll.u32 %s1009_s22, 6 }
  0x73   : > { %v309_v35 = vmul.f32 %v1034_v1, %v308_v31  ;;  %v313_v37 = vstv %s1054_s28  ;;  %v320_v38 = vstv %s1058_s6  ;;  %v324_v39 = vstv %s1060_s30  ;;  %s1104_s27 = sld [smem:[#allocation6 + $0x380]]  ;;  %s1108_s0 = scalar_lea.vmem [#allocation9], %s1237_s29 }
  0x74   : > { %v253_v32 = vmax.f32 %v252_v24, 0.0  ;;  %v273_v36 = vadd.f32 %v272_v18, %v268_v28  ;;  %v289_v40 = vadd.f32 %v288_v26, %v284_v33  ;;  %v305_v41 = vadd.f32 %v304_v34, %v299_v29  ;;  %s1117_s28 = sld [smem:[#allocation6 + $0x381]]  ;;  %s1119_s6 = sld [smem:[#allocation6 + $0x382]] }
  0x75   : > { %v314_v42 = vmul.f32 %v1040_v4, %v313_v37  ;;  %v325_v43 = vmul.f32 %v324_v39, %v1028_v0  ;;  %v329_v45 = vstv %s1065_s8  ;;  %v334_v46 = vstv %s1067_s9  ;;  %s418_s9 = sshll.u32 %s1108_s0, 4  ;;  %s594_s30 = sshll.u32 %s827_s15, 10  ;;  %s1155_s9 = int_to_ptr.vmem [resolvable:$true] %s418_s9 }
  0x76   : > { %255 = vst.msk [vmem:[%s1108_s0] sm:$0xff] %vm254_vm0, %v253_v32  ;;  %v274_v44 = vmax.f32 %v273_v36, 0.0  ;;  %v341_v47 = vstv %s1072_s23  ;;  %v294_v48 = vadd.f32 %v293_v27, %v289_v40  ;;  %v310_v49 = vadd.f32 %v309_v35, %v305_v41  ;;  %s404_s15 = scalar_lea.sflag [#allocation4], %s1009_s22  ;;  %p1238_p0 = scmp.ne.s32.totalorder %s1227_s24, 0 }
  0x77   : > { %v326_v50 = vadd.f32 %v325_v43, %v320_v38  ;;  %v330_v51 = vmul.f32 %v1034_v1, %v329_v45  ;;  %v335_v52 = vmul.f32 %v1040_v4, %v334_v46  ;;  %v345_v53 = vstv %s1074_s20  ;;  %s1162_s20 = scalar_lea.hbm %s1216_s3, %s594_s30 }
  0x78   : > { %546 = vst.msk [vmem:[%s1108_s0 + $0x8] sm:$0xff] %vm254_vm0, %v274_v44  ;;  %v350_v54 = vstv %s1079_s19  ;;  %v355_v55 = vstv %s1081_s4  ;;  %v295_v56 = vmax.f32 %v294_v48, 0.0  ;;  %v315_v57 = vadd.f32 %v314_v42, %v310_v49  ;;  %s745_s19 = scalar_lea.vmem %s1155_s9, 1024  ;;  %s842_s4 = smov [#allocation9]  }
  0x79   : > { %v331_v58 = vadd.f32 %v330_v51, %v326_v50  ;;  %v346_v59 = vmul.f32 %v345_v53, %v1028_v0  ;;  %v351_v60 = vmul.f32 %v1034_v1, %v350_v54  ;;  %v356_v61 = vmul.f32 %v1040_v4, %v355_v55  ;;  %p746_p9 = scmp.ne.s32.totalorder %s1155_s9, %s745_s19 }
  0x7a   : > { %v362_v62 = vstv %s1089_s21  ;;  %v366_v63 = vstv %s1091_s7  ;;  %553 = vst.msk [vmem:[%s1108_s0 + $0x10] sm:$0xff] %vm254_vm0, %v295_v56  ;;  %v316_v2 = vmax.f32 %v315_v57, 0.0  ;;  %v371_v7 = vstv %s1095_s10  ;;  %s749_s21 = sshll.u32 %s842_s4, 4  ;;  %s750_s21 = int_to_ptr.vmem [resolvable:$false] %s749_s21 }
  0x7b   : > { %v336_v3 = vadd.f32 %v335_v52, %v331_v58  ;;  %v347_v5 = vadd.f32 %v346_v59, %v341_v47  ;;  %v367_v6 = vmul.f32 %v366_v63, %v1028_v0  ;;  %v376_v8 = vstv %s1097_s11  ;;  %p747_p1 = pnand %p746_p9, %p1238_p0  ;;  %s751_s7 = scalar_lea.vmem %s750_s21, 2048 }
  0x7c   : > { %v383_v9 = vstv %s1102_s26  ;;  %v387_v10 = vstv %s1104_s27  ;;  %560 = vst.msk [vmem:[%s1108_s0 + $0x18] sm:$0xff] %vm254_vm0, %v316_v2  ;;  %v372_v14 = vmul.f32 %v1034_v1, %v371_v7  ;;  %v377_v15 = vmul.f32 %v1040_v4, %v376_v8  ;;  %p752_p11 = scmp.lt.s32.totalorder %s1155_s9, %s750_s21  ;;  %p753_p7 = scmp.lt.s32.totalorder %s751_s7, %s745_s19 }
  0x7d   : > { %v337_v11 = vmax.f32 %v336_v3, 0.0  ;;  %v352_v12 = vadd.f32 %v351_v60, %v347_v5  ;;  %v368_v13 = vadd.f32 %v367_v6, %v362_v62  ;;  %v388_v16 = vmul.f32 %v387_v10, %v1028_v0  ;;  %p748_p6 = pneg %p747_p1 }
  0x7e   : > { %v392_v17 = vstv %s1117_s28  ;;  %v397_v18 = vstv %s1119_s6  ;;  %p754_p3 = por %p753_p7, %p752_p11 }
  0x7f   : > { %567 = vst.msk [vmem:[%s1108_s0 + $0x20] sm:$0xff] %vm254_vm0, %v337_v11  ;;  %v357_v19 = vadd.f32 %v356_v61, %v352_v12  ;;  %v373_v20 = vadd.f32 %v372_v14, %v368_v13  ;;  %v393_v21 = vmul.f32 %v1034_v1, %v392_v17  ;;  %v389_v22 = vadd.f32 %v388_v16, %v383_v9 }
  0x80   : > { %v398_v23 = vmul.f32 %v1040_v4, %v397_v18  ;;  %p755_p8 = pnand %p754_p3, %p748_p6 }
  0x81   : > { %v358_v24 = vmax.f32 %v357_v19, 0.0  ;;  %v378_v25 = vadd.f32 %v377_v15, %v373_v20  ;;  %v394_v26 = vadd.f32 %v393_v21, %v389_v22 }
  0x83   : > { %574 = vst.msk [vmem:[%s1108_s0 + $0x28] sm:$0xff] %vm254_vm0, %v358_v24  ;;  %v379_v0 = vmax.f32 %v378_v25, 0.0  ;;  %v399_v27 = vadd.f32 %v398_v23, %v394_v26 }
  0x85   : > { %581 = vst.msk [vmem:[%s1108_s0 + $0x30] sm:$0xff] %vm254_vm0, %v379_v0  ;;  %v400_v1 = vmax.f32 %v399_v27, 0.0 }
  0x87   : > { %588 = vst.msk [vmem:[%s1108_s0 + $0x38] sm:$0xff] %vm254_vm0, %v400_v1 }
  0x88   : > { %758 = shalt.err (!%p755_p8)
}
  0x89   : > { %s759_s0 = scalar_lea.hbm %s1162_s20, 1024  ;;  %s763_s26 = scalar_lea.hbm %s1216_s3, 2048 }
  0x8a   : > { %p760_p13 = scmp.ne.s32.totalorder %s1162_s20, %s759_s0  ;;  %p764_p12 = scmp.lt.u32.totalorder %s1162_s20, %s1216_s3 }
  0x8b   : > { %p765_p2 = scmp.lt.u32.totalorder %s763_s26, %s759_s0  ;;  %p767_p9 = scmp.lt.u32.totalorder %s759_s0, %s1162_s20 }
  0x8c   : > { %p761_p4 = pnand %p760_p13, %p1238_p0 }
  0x8d   : > { %p766_p5 = por %p765_p2, %p764_p12 }
  0x8e   : > { %p762_p10 = pneg %p761_p4 }
  0x8f   : > { %p768_p1 = por %p767_p9, %p766_p5 }
  0x91   : > { %p769_p6 = pnand %p768_p1, %p762_p10 }
  0x93   : > { %772 = shalt.err (!%p769_p6)
}
  0x94   : > { %s843_s28 = smov 128   ;;  %s844_s6 = smov 8  }
  0x95   : > { %608 = dma.vmem_to_hbm [thread:$0]  (%p1238_p0), %s1155_s9, 1024, %s1162_s20, %s404_s15, %s843_s28, %s843_s28, %s844_s6  }
  0x96 PF: > { %s433_s30 = sand.u32 1, %s815_s12   ;;  %p1239_p11 = scmp.ne.s32.totalorder %s1228_s25, 0 }
  0x97   : > { %p1240_p7 = scmp.ge.s32.totalorder %s835_s17, 2  ;;  %s434_s8 = scalar_lea.sflag [#allocation4], %s433_s30 }
  0x99   : > { %p622_p3 = pnand %p1240_p7, %p1239_p11 }
  0x9b   : > { %810 = dma.done.wait (!%p622_p3), %s434_s8, 1024  }
  0x9c   : > { %812 = vsyncadd (!%p622_p3), %s434_s8, 4294966272  ;;  %s21_s17 = sadd.s32 1, %s835_s17   ;;  %s1241_s12 = smov %s819_s13 }
  0x9d   : > { %p18_p8 = scmp.ge.s32.totalorder %s21_s17, 4   ;;  %s1242_s13 = smov %s823_s14 }
  0x9e   : > { %s1243_s14 = smov %s976_s5  ;;  %s1244_s15 = smov %s831_s16 }
  0x9f   : > { %s1245_s16 = smov %s1247_s18  ;;  %20 = sbr.rel (!%p18_p8) target bundleno = 10 (0xa), region = 95 }
  0xa6   :  { %439 = vsyncpa [#allocation3], 1 }
  0xa7   :  { %441 = vsyncpa [#allocation3 + $0x1], 1 }
  0xa8   :  { %442 = vsyncpa [#allocation4], 1 }
  0xa9   :  { %444 = vsyncpa [#allocation4 + $0x1], 1 }
  0xaa   :  { %445 = vsyncpa [#allocation5], 1 }
  0xab   :  { %447 = vsyncpa [#allocation5 + $0x1], 1 }
  0xac   :  { %448 = vsyncpa [#allocation8], 1 }

</bundles_post_ra>
